<compile_context>
chip_gen: v7x
topology: tpu7x:2x2x1
jax: 0.10.0
libtpu: 0.0.40
codegen_flags: <defaults>
</compile_context>

<pallas_src>
import jax
import jax.numpy as jnp
from jax import lax
from jax.experimental import pallas as pl
from jax.experimental.pallas import tpu as pltpu


def cf_kernel(w_ref, x_ref, b_ref, o_ref):
    # w tile: (tm, tk), x tile: (tn, tk) -> contract last dims: (tm, tn).
    acc = lax.dot_general(
        w_ref[...],
        x_ref[...],
        dimension_numbers=(((1,), (1,)), ((), ())),
        preferred_element_type=jnp.float32,
    )

    k = pl.program_id(2)

    @pl.when(k == 0)
    def _():
        # Fold the bias into the first (for the demo shape, only) k step.
        o_ref[...] = acc + b_ref[...]

    @pl.when(k != 0)
    def _():
        # Output block is resident across the k axis; accumulate in place.
        o_ref[...] += acc


def _tpu_generation_info():
    """(tensorcores_per_chip, physical_vmem_bytes) with a safe fallback."""
    try:
        kind = str(getattr(jax.devices()[0], "device_kind", "")).lower()
    except Exception:  # pragma: no cover - defensive; never expected on TPU
        kind = ""
    two_tc = "v7" in kind
    vmem_bytes = (64 if two_tc else 128) * (1 << 20)
    return (2 if two_tc else 1), vmem_bytes


def _pick_tile(dim, cap, unit):
    """Largest legal tile <= cap: full extent, or a multiple of `unit` dividing dim."""
    if dim <= cap:
        return dim
    t = (cap // unit) * unit
    while t >= unit:
        if dim % t == 0:
            return t
        t -= unit
    # No legal divisor under the cap: fall back to the full extent
    # (always a legal full-extent block; may cost VMEM but never fails lowering).
    return dim


def _select_tiles(rows, columns, features, num_cores):
    # tm: sublane-aligned (x8); tn/tk: lane-aligned (x128) for unmasked stores
    # and legal (8,128) BlockSpecs.
    tm = _pick_tile(rows, 256, 8)
    tk = _pick_tile(features, 512, 128)
    tn_cap = 256
    if num_cores >= 2 and columns >= 256:
        # Ensure >= 2 steps along the "parallel" j axis so both v7x TCs get work,
        # while keeping tn a multiple of 128 (lane-dense output stores).
        tn_cap = min(tn_cap, max(128, ((columns // 2) // 128) * 128))
    tn = _pick_tile(columns, tn_cap, 128)
    return tm, tn, tk


def cf_forward(w, x, b, *, tm=None, tn=None, tk=None):
    rows, features = w.shape
    columns, _ = x.shape

    num_cores, physical_vmem = _tpu_generation_info()
    atm, atn, atk = _select_tiles(rows, columns, features, num_cores)
    tm = atm if tm is None else tm
    tn = atn if tn is None else tn
    tk = atk if tk is None else tk
    assert rows % tm == 0 and columns % tn == 0 and features % tk == 0, (
        "tile sizes must divide (rows, columns, features)"
    )

    # VMEM budget: double-buffered input tiles + double-buffered output tile
    # + lane-padded bias tile.  Only raise the scoped limit if actually needed.
    needed = 4 * (2 * (tm * tk + tk * tn + tm * 128) + 2 * tm * tn)
    vmem_limit = None
    if needed > 30 * (1 << 20):
        vmem_limit = min(int(needed * 1.25), physical_vmem - (8 << 20))

    grid = (rows // tm, columns // tn, features // tk)

    cost = pl.CostEstimate(
        flops=2 * rows * columns * features,
        transcendentals=0,
        bytes_accessed=4 * (rows * features + columns * features + rows + rows * columns),
    )

    return pl.pallas_call(
        cf_kernel,
        out_shape=jax.ShapeDtypeStruct((rows, columns), jnp.float32),
        grid_spec=pltpu.PrefetchScalarGridSpec(
            num_scalar_prefetch=0,
            grid=grid,
            in_specs=[
                pl.BlockSpec((tm, tk), lambda i, j, k: (i, k)),  # w
                pl.BlockSpec((tn, tk), lambda i, j, k: (j, k)),  # x
                pl.BlockSpec((tm, 1), lambda i, j, k: (i, 0)),   # b (constant over j,k)
            ],
            out_specs=pl.BlockSpec((tm, tn), lambda i, j, k: (i, j)),
        ),
        compiler_params=pltpu.CompilerParams(
            dimension_semantics=("parallel", "parallel", "arbitrary"),
            vmem_limit_bytes=vmem_limit,
        ),
        cost_estimate=cost,
    )(w, x, b)


if __name__ == "__main__":
    # Deterministic "relation" shape and feature dim (synthetic parameter init,
    # matching nn.Parameter(torch.randn(...)) shapes).
    rows, columns, features = 128, 256, 64

    key = jax.random.PRNGKey(0)
    kw, kx, kb = jax.random.split(key, 3)
    w = jax.random.normal(kw, (rows, features), dtype=jnp.float32)
    x = jax.random.normal(kx, (columns, features), dtype=jnp.float32)
    b = jax.random.normal(kb, (rows, 1), dtype=jnp.float32)

    out = cf_forward(w, x, b)
    jax.block_until_ready(out)

    # Reference check against plain JAX (same semantics as torch.matmul(w, x.T) + b).
    ref = jnp.matmul(w, x.T) + b
    assert out.shape == (rows, columns)
    assert jnp.allclose(out, ref, atol=1e-4, rtol=1e-4)

    print("KERNEL_OK")
</pallas_src>

<mosaic_0001>
module attributes {stable_mosaic.version = 11 : i64} {
  func.func @cf_kernel(%arg0: i32, %arg1: i32, %arg2: i32, %arg3: memref<128x64xf32, #tpu.memory_space<vmem>>, %arg4: memref<256x64xf32, #tpu.memory_space<vmem>>, %arg5: memref<128x1xf32, #tpu.memory_space<vmem>>, %arg6: memref<128x256xf32, #tpu.memory_space<vmem>>) attributes {dimension_semantics = [#tpu.dimension_semantics<parallel>, #tpu.dimension_semantics<parallel>, #tpu.dimension_semantics<arbitrary>], iteration_bounds = array<i64: 1, 1, 1>, scalar_prefetch = 0 : i64, scratch_operands = 0 : i64, tpu.core_type = #tpu.core_type<tc>, window_params = [{transform_indices = @transform_0, window_bounds = array<i64: 128, 64>}, {transform_indices = @transform_1, window_bounds = array<i64: 256, 64>}, {transform_indices = @transform_2, window_bounds = array<i64: 128, 1>}, {transform_indices = @transform_3, window_bounds = array<i64: 128, 256>}]} {
    %c0 = arith.constant 0 : index
    %c0_0 = arith.constant 0 : index
    %0 = vector.load %arg3[%c0, %c0_0] : memref<128x64xf32, #tpu.memory_space<vmem>>, vector<128x64xf32>
    %c0_1 = arith.constant 0 : index
    %c0_2 = arith.constant 0 : index
    %1 = vector.load %arg4[%c0_1, %c0_2] : memref<256x64xf32, #tpu.memory_space<vmem>>, vector<256x64xf32>
    %cst = arith.constant dense<0.000000e+00> : vector<128x256xf32>
    %2 = tpu.matmul %0, %1, %cst {dimension_numbers = #tpu.dot_dimension_numbers<[1], [1], [0], [0], [0, 0, 1, 0], [], []>} : vector<128x64xf32>, vector<256x64xf32>, vector<128x256xf32> -> vector<128x256xf32>
    %c0_i32 = arith.constant 0 : i32
    %3 = arith.cmpi eq, %arg2, %c0_i32 : i32
    %4 = arith.extui %3 : i1 to i32
    %c0_i32_3 = arith.constant 0 : i32
    %5 = arith.cmpi ne, %4, %c0_i32_3 : i32
    scf.if %5 {
      %c0_6 = arith.constant 0 : index
      %c0_7 = arith.constant 0 : index
      %9 = vector.load %arg5[%c0_6, %c0_7] : memref<128x1xf32, #tpu.memory_space<vmem>>, vector<128x1xf32>
      %10 = vector.broadcast %9 : vector<128x1xf32> to vector<128x256xf32>
      %11 = arith.addf %2, %10 : vector<128x256xf32>
      %c0_8 = arith.constant 0 : index
      %c0_9 = arith.constant 0 : index
      %12 = vector.load %arg6[%c0_8, %c0_9] : memref<128x256xf32, #tpu.memory_space<vmem>>, vector<128x256xf32>
      tpu.vector_store %arg6[%c0_8, %c0_9], %11 {strides = array<i32>} : memref<128x256xf32, #tpu.memory_space<vmem>>, vector<128x256xf32>,
    } else {
    }
    %c0_i32_4 = arith.constant 0 : i32
    %6 = arith.cmpi ne, %arg2, %c0_i32_4 : i32
    %7 = arith.extui %6 : i1 to i32
    %c0_i32_5 = arith.constant 0 : i32
    %8 = arith.cmpi ne, %7, %c0_i32_5 : i32
    scf.if %8 {
      %c0_6 = arith.constant 0 : index
      %c0_7 = arith.constant 0 : index
      %9 = vector.load %arg6[%c0_6, %c0_7] : memref<128x256xf32, #tpu.memory_space<vmem>>, vector<128x256xf32>
      %10 = arith.addf %9, %2 : vector<128x256xf32>
      %c0_8 = arith.constant 0 : index
      %c0_9 = arith.constant 0 : index
      %11 = vector.load %arg6[%c0_8, %c0_9] : memref<128x256xf32, #tpu.memory_space<vmem>>, vector<128x256xf32>
      tpu.vector_store %arg6[%c0_8, %c0_9], %10 {strides = array<i32>} : memref<128x256xf32, #tpu.memory_space<vmem>>, vector<128x256xf32>,
    } else {
    }
    return
  }
  func.func @transform_0(%arg0: i32, %arg1: i32, %arg2: i32) -> (i32, i32) {
    %c0_i32 = arith.constant 0 : i32
    return %arg0, %arg2 : i32, i32
  }
  func.func @transform_1(%arg0: i32, %arg1: i32, %arg2: i32) -> (i32, i32) {
    %c0_i32 = arith.constant 0 : i32
    return %arg1, %arg2 : i32, i32
  }
  func.func @transform_2(%arg0: i32, %arg1: i32, %arg2: i32) -> (i32, i32) {
    %c0_i32 = arith.constant 0 : i32
    %c0_i32_0 = arith.constant 0 : i32
    return %arg0, %c0_i32 : i32, i32
  }
  func.func @transform_3(%arg0: i32, %arg1: i32, %arg2: i32) -> (i32, i32) {
    %c0_i32 = arith.constant 0 : i32
    return %arg0, %arg1 : i32, i32
  }
}

</mosaic_0001>

<bundles_post_ra>
// kernel: tpu_custom_call.1
= control target key start
LH: loop header
LB: loop body
LE: loop exit
PB: predicated region body
PF: predicated region fallthrough
CT: control target
= control target key end

     0   :  { %vm63_vm0 = vcmask 523264   ;;  %v855_v7 = vmov 0   ;;  %s1209_s0 = inlined_call_operand.vmem [shape: f32[128,64], index: 0, kind: input, shape index: {}]   ;;  %s1210_s1 = inlined_call_operand.vmem [shape: f32[256,64], index: 1, kind: input, shape index: {}]   ;;  %s1211_s2 = inlined_call_operand.vmem [shape: f32[128,1], index: 2, kind: input, shape index: {}]   ;;  %s1212_s3 = inlined_call_operand.hbm [shape: f32[128,256], index: 3, kind: output, shape index: {}]  }
   0x1   :  { %v47_v0 = vld [vmem:[%s1210_s1 + $0x80] sm:$0xff]  ;;  %v48_v1 = vld [vmem:[%s1210_s1 + $0x88] sm:$0xff]  ;;  %vm890_vm1 = vmpackc.low %vm63_vm0, %vm63_vm0  ;;  %830 = vset.pattern.permute.xlu1 %v855_v7  ;;  %829 = vset.pattern.permute.xlu0 %v855_v7 }
   0x2   :  { %v31_v2 = vld [vmem:[%s1210_s1] sm:$0xff]  ;;  %v761_v3 = vpack.c.bf16 %v48_v1, %v47_v0  ;;  %v32_v5 = vld [vmem:[%s1210_s1 + $0x8] sm:$0xff]  ;;  %v49_v6 = vld [vmem:[%s1210_s1 + $0x90] sm:$0xff] }
   0x3   :  { %v764_v8 = vpack.c.bf16 %v32_v5, %v31_v2  ;;  %v50_v9 = vld [vmem:[%s1210_s1 + $0x98] sm:$0xff]  ;;  %v33_v11 = vld [vmem:[%s1210_s1 + $0x10] sm:$0xff]  ;;  %v51_v13 = vld [vmem:[%s1210_s1 + $0xa0] sm:$0xff] }
   0x4   :  { %763 = vmatprep.subr.msk.bf16.mxu0 %vm890_vm1, %v761_v3  ;;  %809 = vmatprep.subr.msk.bf16.mxu1 %vm890_vm1, %v761_v3  ;;  %v767_v10 = vpack.c.bf16 %v50_v9, %v49_v6  ;;  %v34_v12 = vld [vmem:[%s1210_s1 + $0x18] sm:$0xff]  ;;  %v52_v14 = vld [vmem:[%s1210_s1 + $0xa8] sm:$0xff]  ;;  %v930_v17 = vld [vmem:[%s1209_s0] sm:$0xff] }
   0x5   :  { %766 = vmatpush3.bf16.xpose.msk.msra.mxu0 %vm890_vm1, %v764_v8  ;;  %817 = vmatpush3.bf16.xpose.msk.msra.mxu1 %vm890_vm1, %v764_v8  ;;  %v770_v15 = vpack.c.bf16 %v34_v12, %v33_v11  ;;  %v773_v16 = vpack.c.bf16 %v52_v14, %v51_v13  ;;  %v935_v18 = vld [vmem:[%s1209_s0 + $0x40] sm:$0xff]  ;;  %v36_v20 = vld [vmem:[%s1210_s1 + $0x28] sm:$0xff]  ;;  %v53_v21 = vld [vmem:[%s1210_s1 + $0xb0] sm:$0xff] }
   0x6   :  { %769 = vmatprep.subr.msk.bf16.mxu0 %vm890_vm1, %v767_v10  ;;  %810 = vmatprep.subr.msk.bf16.mxu1 %vm890_vm1, %v767_v10  ;;  %v35_v19 = vld [vmem:[%s1210_s1 + $0x20] sm:$0xff]  ;;  %v54_v22 = vld [vmem:[%s1210_s1 + $0xb8] sm:$0xff]  ;;  %v375_v24 = vld [vmem:[%s1211_s2 + $0x10] sm:$0xff] }
   0x7   :  { %729 = vmatprep.mubr.msk.f32.mxu0 %vm63_vm0, %v930_v17  ;;  %745 = vmatprep.mubr.msk.f32.mxu1 %vm63_vm0, %v935_v18  ;;  %v776_v23 = vpack.c.bf16 %v36_v20, %v35_v19  ;;  %v373_v25 = vld [vmem:[%s1211_s2] sm:$0xff]  ;;  %v779_v26 = vpack.c.bf16 %v54_v22, %v53_v21  ;;  %v376_v27 = vld [vmem:[%s1211_s2 + $0x18] sm:$0xff]  ;;  %v374_v28 = vld [vmem:[%s1211_s2 + $0x8] sm:$0xff] }
   0x8   :  { %401 = vperm.xlu1 %830, %v375_v24   ;;  %391 = vperm.xlu0 %829, %v373_v25   ;;  %v37_v29 = vld [vmem:[%s1210_s1 + $0x30] sm:$0xff]  ;;  %v38_v30 = vld [vmem:[%s1210_s1 + $0x38] sm:$0xff] }
   0xd   :  { %772 = vmatpush3.bf16.xpose.msk.msra.mxu0 %vm890_vm1, %v770_v15  ;;  %818 = vmatpush3.bf16.xpose.msk.msra.mxu1 %vm890_vm1, %v770_v15 }
   0xe   :  { %775 = vmatprep.subr.msk.bf16.mxu0 %vm890_vm1, %v773_v16  ;;  %811 = vmatprep.subr.msk.bf16.mxu1 %vm890_vm1, %v773_v16 }
  0x15   :  { %778 = vmatpush3.bf16.xpose.msk.msra.mxu0 %vm890_vm1, %v776_v23  ;;  %819 = vmatpush3.bf16.xpose.msk.msra.mxu1 %vm890_vm1, %v776_v23 }
  0x16   :  { %781 = vmatprep.subr.msk.bf16.mxu0 %vm890_vm1, %v779_v26  ;;  %812 = vmatprep.subr.msk.bf16.mxu1 %vm890_vm1, %v779_v26 }
  0x17   :  { %8 = vsyncpa [#allocation3], 0  ;;  %v55_v31 = vld [vmem:[%s1210_s1 + $0xc0] sm:$0xff]  ;;  %v56_v32 = vld [vmem:[%s1210_s1 + $0xc8] sm:$0xff]  ;;  %406 = vperm.xlu1 %830, %v376_v27   ;;  %396 = vperm.xlu0 %829, %v374_v28   ;;  %v782_v35 = vpack.c.bf16 %v38_v30, %v37_v29 }
  0x18   :  { %v378_v33 = vld [vmem:[%s1211_s2 + $0x28] sm:$0xff]  ;;  %v377_v34 = vld [vmem:[%s1211_s2 + $0x20] sm:$0xff]  ;;  %v785_v36 = vpack.c.bf16 %v56_v32, %v55_v31  ;;  %v380_v37 = vld [vmem:[%s1211_s2 + $0x38] sm:$0xff] }
  0x19   :  { %v379_v38 = vld [vmem:[%s1211_s2 + $0x30] sm:$0xff]  ;;  %v39_v39 = vld [vmem:[%s1210_s1 + $0x40] sm:$0xff]  ;;  %v40_v40 = vld [vmem:[%s1210_s1 + $0x48] sm:$0xff] }
  0x1a   :  { %v57_v41 = vld [vmem:[%s1210_s1 + $0xd0] sm:$0xff]  ;;  %v58_v42 = vld [vmem:[%s1210_s1 + $0xd8] sm:$0xff]  ;;  %v382_v43 = vld [vmem:[%s1211_s2 + $0x48] sm:$0xff]  ;;  %v788_v45 = vpack.c.bf16 %v40_v40, %v39_v39 }
  0x1b   :  { %416 = vperm.xlu1 %830, %v378_v33   ;;  %411 = vperm.xlu0 %829, %v377_v34   ;;  %v381_v44 = vld [vmem:[%s1211_s2 + $0x40] sm:$0xff]  ;;  %v791_v46 = vpack.c.bf16 %v58_v42, %v57_v41  ;;  %v384_v47 = vld [vmem:[%s1211_s2 + $0x58] sm:$0xff]  ;;  %v383_v48 = vld [vmem:[%s1211_s2 + $0x50] sm:$0xff] }
  0x1c   :  { %v41_v49 = vld [vmem:[%s1210_s1 + $0x50] sm:$0xff]  ;;  %v42_v50 = vld [vmem:[%s1210_s1 + $0x58] sm:$0xff]  ;;  %v59_v51 = vld [vmem:[%s1210_s1 + $0xe0] sm:$0xff] }
  0x1d   :  { %784 = vmatpush3.bf16.xpose.msk.msra.mxu0 %vm890_vm1, %v782_v35  ;;  %820 = vmatpush3.bf16.xpose.msk.msra.mxu1 %vm890_vm1, %v782_v35  ;;  %v60_v52 = vld [vmem:[%s1210_s1 + $0xe8] sm:$0xff]  ;;  %v385_v54 = vld [vmem:[%s1211_s2 + $0x60] sm:$0xff]  ;;  %v794_v55 = vpack.c.bf16 %v42_v50, %v41_v49  ;;  %v388_v57 = vld [vmem:[%s1211_s2 + $0x78] sm:$0xff] }
  0x1e   :  { %787 = vmatprep.subr.msk.bf16.mxu0 %vm890_vm1, %v785_v36  ;;  %813 = vmatprep.subr.msk.bf16.mxu1 %vm890_vm1, %v785_v36  ;;  %v386_v53 = vld [vmem:[%s1211_s2 + $0x68] sm:$0xff]  ;;  %v797_v56 = vpack.c.bf16 %v60_v52, %v59_v51  ;;  %v387_v58 = vld [vmem:[%s1211_s2 + $0x70] sm:$0xff]  ;;  %v43_v59 = vld [vmem:[%s1210_s1 + $0x60] sm:$0xff] }
  0x1f   :  { %426 = vperm.xlu1 %830, %v380_v37   ;;  %421 = vperm.xlu0 %829, %v379_v38   ;;  %v44_v60 = vld [vmem:[%s1210_s1 + $0x68] sm:$0xff]  ;;  %v61_v61 = vld [vmem:[%s1210_s1 + $0xf0] sm:$0xff]  ;;  %v62_v62 = vld [vmem:[%s1210_s1 + $0xf8] sm:$0xff] }
  0x20   :  { %v800_v63 = vpack.c.bf16 %v44_v60, %v43_v59  ;;  %v803_v0 = vpack.c.bf16 %v62_v62, %v61_v61  ;;  %v45_v1 = vld [vmem:[%s1210_s1 + $0x70] sm:$0xff]  ;;  %v46_v2 = vld [vmem:[%s1210_s1 + $0x78] sm:$0xff]  ;;  %v16_v5 = vld [vmem:[%s1209_s0 + $0x8] sm:$0xff] }
  0x21   :  { %v806_v3 = vpack.c.bf16 %v46_v2, %v45_v1  ;;  %v24_v6 = vld [vmem:[%s1209_s0 + $0x48] sm:$0xff]  ;;  %v17_v4 = vld [vmem:[%s1209_s0 + $0x10] sm:$0xff]  ;;  %v18_v8 = vld [vmem:[%s1209_s0 + $0x18] sm:$0xff] }
  0x22   :  { %v25_v7 = vld [vmem:[%s1209_s0 + $0x50] sm:$0xff]  ;;  %v26_v9 = vld [vmem:[%s1209_s0 + $0x58] sm:$0xff]  ;;  %v19_v10 = vld [vmem:[%s1209_s0 + $0x20] sm:$0xff] }
  0x23   :  { %436 = vperm.xlu1 %830, %v382_v43   ;;  %431 = vperm.xlu0 %829, %v381_v44   ;;  %v27_v11 = vld [vmem:[%s1209_s0 + $0x60] sm:$0xff]  ;;  %v20_v12 = vld [vmem:[%s1209_s0 + $0x28] sm:$0xff]  ;;  %v21_v14 = vld [vmem:[%s1209_s0 + $0x30] sm:$0xff] }
  0x24   :  { %v28_v13 = vld [vmem:[%s1209_s0 + $0x68] sm:$0xff]  ;;  %v29_v15 = vld [vmem:[%s1209_s0 + $0x70] sm:$0xff]  ;;  %v22_v16 = vld [vmem:[%s1209_s0 + $0x38] sm:$0xff] }
  0x25   :  { %790 = vmatpush3.bf16.xpose.msk.msra.mxu0 %vm890_vm1, %v788_v45  ;;  %821 = vmatpush3.bf16.xpose.msk.msra.mxu1 %vm890_vm1, %v788_v45 }
  0x26   :  { %793 = vmatprep.subr.msk.bf16.mxu0 %vm890_vm1, %v791_v46  ;;  %814 = vmatprep.subr.msk.bf16.mxu1 %vm890_vm1, %v791_v46 }
  0x27   :  { %446 = vperm.xlu1 %830, %v384_v47   ;;  %441 = vperm.xlu0 %829, %v383_v48  }
  0x2b   :  { %456 = vperm.xlu1 %830, %v386_v53   ;;  %451 = vperm.xlu0 %829, %v385_v54  }
  0x2d   :  { %796 = vmatpush3.bf16.xpose.msk.msra.mxu0 %vm890_vm1, %v794_v55  ;;  %822 = vmatpush3.bf16.xpose.msk.msra.mxu1 %vm890_vm1, %v794_v55 }
  0x2e   :  { %799 = vmatprep.subr.msk.bf16.mxu0 %vm890_vm1, %v797_v56  ;;  %815 = vmatprep.subr.msk.bf16.mxu1 %vm890_vm1, %v797_v56 }
  0x2f   :  { %466 = vperm.xlu1 %830, %v388_v57   ;;  %461 = vperm.xlu0 %829, %v387_v58  }
  0x35   :  { %802 = vmatpush3.bf16.xpose.msk.msra.mxu0 %vm890_vm1, %v800_v63  ;;  %823 = vmatpush3.bf16.xpose.msk.msra.mxu1 %vm890_vm1, %v800_v63 }
  0x36   :  { %805 = vmatprep.subr.msk.bf16.mxu0 %vm890_vm1, %v803_v0  ;;  %816 = vmatprep.subr.msk.bf16.mxu1 %vm890_vm1, %v803_v0 }
  0x3d   :  { %808 = vmatpush3.bf16.xpose.msk.msra.mxu0 %vm890_vm1, %v806_v3  ;;  %824 = vmatpush3.bf16.xpose.msk.msra.mxu1 %vm890_vm1, %v806_v3 }
  0x44   :  { %730 = vmatmul.mubr.msk.f32.vlgmr.msra.gmra.mrb[0].mxu0 %vm63_vm0, %v930_v17  ;;  %746 = vmatmul.mubr.msk.f32.vlgmr.msra.gmra.mrb[0].mxu1 %vm63_vm0, %v935_v18  ;;  %v30_v17 = vld [vmem:[%s1209_s0 + $0x78] sm:$0xff]  ;;  %s856_s0 = smov [#allocation2]  }
  0x45   :  { %731 = vmatprep.mubr.msk.f32.mxu0 %vm63_vm0, %v16_v5  ;;  %747 = vmatprep.mubr.msk.f32.mxu1 %vm63_vm0, %v24_v6  ;;  %s638_s29 = sshll.u32 %s856_s0, 4  ;;  %s639_s29 = int_to_ptr.vmem [resolvable:$true] %s638_s29 }
  0x46   :  { %s831_s30 = scalar_lea.vmem %s639_s29, 4096  ;;  %p836_p1 = scmp.lt.s32.totalorder %s639_s29, %s639_s29 }
  0x47   :  { %p832_p0 = scmp.ne.s32.totalorder %s639_s29, %s831_s30  ;;  %p837_p2 = scmp.lt.s32.totalorder %s831_s30, %s831_s30 }
  0x48   :  { %732 = vmatmul.mubr.msk.f32.gmra.mrb[2].mxu0 %vm63_vm0, %v16_v5  ;;  %748 = vmatmul.mubr.msk.f32.gmra.mrb[2].mxu1 %vm63_vm0, %v24_v6 }
  0x49   :  { %733 = vmatprep.mubr.msk.f32.mxu0 %vm63_vm0, %v17_v4  ;;  %749 = vmatprep.mubr.msk.f32.mxu1 %vm63_vm0, %v25_v7  ;;  %p838_p3 = por %p837_p2, %p836_p1 }
  0x4b   :  { %p839_p4 = pnand %p838_p3, %p832_p0 }
  0x4c   :  { %734 = vmatmul.mubr.msk.f32.gmra.mrb[4].mxu0 %vm63_vm0, %v17_v4  ;;  %750 = vmatmul.mubr.msk.f32.gmra.mrb[4].mxu1 %vm63_vm0, %v25_v7 }
  0x4d   :  { %735 = vmatprep.mubr.msk.f32.mxu0 %vm63_vm0, %v18_v8  ;;  %751 = vmatprep.mubr.msk.f32.mxu1 %vm63_vm0, %v26_v9 }
  0x50   :  { %736 = vmatmul.mubr.msk.f32.gmra.mrb[6].mxu0 %vm63_vm0, %v18_v8  ;;  %752 = vmatmul.mubr.msk.f32.gmra.mrb[6].mxu1 %vm63_vm0, %v26_v9 }
  0x51   :  { %737 = vmatprep.mubr.msk.f32.mxu0 %vm63_vm0, %v19_v10  ;;  %753 = vmatprep.mubr.msk.f32.mxu1 %vm63_vm0, %v27_v11 }
  0x54   :  { %738 = vmatmul.mubr.msk.f32.gmra.mrb[8].mxu0 %vm63_vm0, %v19_v10  ;;  %754 = vmatmul.mubr.msk.f32.gmra.mrb[8].mxu1 %vm63_vm0, %v27_v11 }
  0x55   :  { %739 = vmatprep.mubr.msk.f32.mxu0 %vm63_vm0, %v20_v12  ;;  %755 = vmatprep.mubr.msk.f32.mxu1 %vm63_vm0, %v28_v13 }
  0x58   :  { %740 = vmatmul.mubr.msk.f32.gmra.mrb[10].mxu0 %vm63_vm0, %v20_v12  ;;  %756 = vmatmul.mubr.msk.f32.gmra.mrb[10].mxu1 %vm63_vm0, %v28_v13 }
  0x59   :  { %741 = vmatprep.mubr.msk.f32.mxu0 %vm63_vm0, %v21_v14  ;;  %757 = vmatprep.mubr.msk.f32.mxu1 %vm63_vm0, %v29_v15 }
  0x5c   :  { %742 = vmatmul.mubr.msk.f32.gmra.mrb[12].mxu0 %vm63_vm0, %v21_v14  ;;  %758 = vmatmul.mubr.msk.f32.gmra.mrb[12].mxu1 %vm63_vm0, %v29_v15 }
  0x5d   :  { %743 = vmatprep.mubr.msk.f32.mxu0 %vm63_vm0, %v22_v16  ;;  %759 = vmatprep.mubr.msk.f32.mxu1 %vm63_vm0, %v30_v17 }
  0x60   :  { %744 = vmatmul.mubr.msk.f32.gmra.mrb[14].mxu0 %vm63_vm0, %v22_v16  ;;  %760 = vmatmul.mubr.msk.f32.gmra.mrb[14].mxu1 %vm63_vm0, %v30_v17 }
  0x87   :  { %v392_v18 = vpop.permute.xlu0 %391  ;;  %v402_v19 = vpop.permute.xlu1 %401 }
  0x96   :  { %v397_v20 = vpop.permute.xlu0 %396  ;;  %v407_v21 = vpop.permute.xlu1 %406 }
  0x9a   :  { %v1181_v22 = vpop.permute.xlu0 %411  ;;  %v1183_v23 = vpop.permute.xlu1 %416 }
  0x9e   :  { %v1185_v24 = vpop.permute.xlu0 %421  ;;  %v1187_v25 = vpop.permute.xlu1 %426 }
  0xa2   :  { %v432_v26 = vpop.permute.xlu0 %431  ;;  %v437_v35 = vpop.permute.xlu1 %436 }
  0xa6   :  { %v442_v44 = vpop.permute.xlu0 %441  ;;  %v447_v53 = vpop.permute.xlu1 %446 }
  0xaa   :  { %v452_v62 = vpop.permute.xlu0 %451  ;;  %v457_v7 = vpop.permute.xlu1 %456 }
  0xae   :  { %v462_v16 = vpop.permute.xlu0 %461 }
 0x117   :  { %v274_v27 = vpop.f32.mrb[0].mxu0  ;;  %v322_v28 = vpop.f32.mrb[0].mxu1 }
 0x118   :  { %v469_v29 = vadd.f32 %v392_v18, %v274_v27  ;;  %v485_v30 = vadd.f32 %v432_v26, %v322_v28  ;;  %v276_v31 = vpop.f32.mrb[1].mxu0  ;;  %v324_v32 = vpop.f32.mrb[1].mxu1 }
 0x119   :  { %v470_v33 = vadd.f32 %v392_v18, %v276_v31  ;;  %v486_v34 = vadd.f32 %v432_v26, %v324_v32  ;;  %v467_v28 = vpop.permute.xlu1 %466 }
 0x11a   :  { %501 = vst [vmem:[#allocation2] sm:$0xff] %v469_v29  ;;  %517 = vst [vmem:[#allocation2 + $0x80] sm:$0xff] %v485_v30 }
 0x11b   :  { %502 = vst [vmem:[#allocation2 + $0x8] sm:$0xff] %v470_v33  ;;  %518 = vst [vmem:[#allocation2 + $0x88] sm:$0xff] %v486_v34  ;;  %v280_v36 = vpop.f32.mrb[2].mxu0  ;;  %v328_v37 = vpop.f32.mrb[2].mxu1 }
 0x11c   :  { %v471_v38 = vadd.f32 %v397_v20, %v280_v36  ;;  %v487_v39 = vadd.f32 %v437_v35, %v328_v37  ;;  %v282_v40 = vpop.f32.mrb[3].mxu0  ;;  %v330_v41 = vpop.f32.mrb[3].mxu1 }
 0x11d   :  { %v472_v42 = vadd.f32 %v397_v20, %v282_v40  ;;  %v488_v43 = vadd.f32 %v437_v35, %v330_v41 }
 0x11e   :  { %503 = vst [vmem:[#allocation2 + $0x10] sm:$0xff] %v471_v38  ;;  %519 = vst [vmem:[#allocation2 + $0x90] sm:$0xff] %v487_v39 }
 0x11f   :  { %504 = vst [vmem:[#allocation2 + $0x18] sm:$0xff] %v472_v42  ;;  %520 = vst [vmem:[#allocation2 + $0x98] sm:$0xff] %v488_v43  ;;  %v286_v45 = vpop.f32.mrb[4].mxu0  ;;  %v334_v46 = vpop.f32.mrb[4].mxu1 }
 0x120   :  { %v473_v47 = vadd.f32 %v402_v19, %v286_v45  ;;  %v489_v48 = vadd.f32 %v442_v44, %v334_v46  ;;  %v288_v49 = vpop.f32.mrb[5].mxu0  ;;  %v336_v50 = vpop.f32.mrb[5].mxu1 }
 0x121   :  { %v474_v51 = vadd.f32 %v402_v19, %v288_v49  ;;  %v490_v52 = vadd.f32 %v442_v44, %v336_v50 }
 0x122   :  { %505 = vst [vmem:[#allocation2 + $0x20] sm:$0xff] %v473_v47  ;;  %521 = vst [vmem:[#allocation2 + $0xa0] sm:$0xff] %v489_v48 }
 0x123   :  { %506 = vst [vmem:[#allocation2 + $0x28] sm:$0xff] %v474_v51  ;;  %522 = vst [vmem:[#allocation2 + $0xa8] sm:$0xff] %v490_v52  ;;  %v292_v54 = vpop.f32.mrb[6].mxu0  ;;  %v340_v55 = vpop.f32.mrb[6].mxu1 }
 0x124   :  { %v475_v56 = vadd.f32 %v407_v21, %v292_v54  ;;  %v491_v57 = vadd.f32 %v447_v53, %v340_v55  ;;  %v294_v58 = vpop.f32.mrb[7].mxu0  ;;  %v342_v59 = vpop.f32.mrb[7].mxu1 }
 0x125   :  { %v476_v60 = vadd.f32 %v407_v21, %v294_v58  ;;  %v492_v61 = vadd.f32 %v447_v53, %v342_v59 }
 0x126   :  { %507 = vst [vmem:[#allocation2 + $0x30] sm:$0xff] %v475_v56  ;;  %523 = vst [vmem:[#allocation2 + $0xb0] sm:$0xff] %v491_v57 }
 0x127   :  { %508 = vst [vmem:[#allocation2 + $0x38] sm:$0xff] %v476_v60  ;;  %524 = vst [vmem:[#allocation2 + $0xb8] sm:$0xff] %v492_v61  ;;  %v298_v63 = vpop.f32.mrb[8].mxu0  ;;  %v346_v0 = vpop.f32.mrb[8].mxu1 }
 0x128   :  { %v477_v1 = vadd.f32 %v1181_v22, %v298_v63  ;;  %v493_v2 = vadd.f32 %v452_v62, %v346_v0  ;;  %v300_v3 = vpop.f32.mrb[9].mxu0  ;;  %v348_v5 = vpop.f32.mrb[9].mxu1 }
 0x129   :  { %v478_v6 = vadd.f32 %v1181_v22, %v300_v3  ;;  %v494_v4 = vadd.f32 %v452_v62, %v348_v5 }
 0x12a   :  { %509 = vst [vmem:[#allocation2 + $0x40] sm:$0xff] %v477_v1  ;;  %525 = vst [vmem:[#allocation2 + $0xc0] sm:$0xff] %v493_v2 }
 0x12b   :  { %510 = vst [vmem:[#allocation2 + $0x48] sm:$0xff] %v478_v6  ;;  %526 = vst [vmem:[#allocation2 + $0xc8] sm:$0xff] %v494_v4  ;;  %v304_v8 = vpop.f32.mrb[10].mxu0  ;;  %v352_v9 = vpop.f32.mrb[10].mxu1 }
 0x12c   :  { %v479_v10 = vadd.f32 %v1183_v23, %v304_v8  ;;  %v495_v11 = vadd.f32 %v457_v7, %v352_v9  ;;  %v306_v12 = vpop.f32.mrb[11].mxu0  ;;  %v354_v13 = vpop.f32.mrb[11].mxu1 }
 0x12d   :  { %v480_v14 = vadd.f32 %v1183_v23, %v306_v12  ;;  %v496_v15 = vadd.f32 %v457_v7, %v354_v13 }
 0x12e   :  { %511 = vst [vmem:[#allocation2 + $0x50] sm:$0xff] %v479_v10  ;;  %527 = vst [vmem:[#allocation2 + $0xd0] sm:$0xff] %v495_v11 }
 0x12f   :  { %512 = vst [vmem:[#allocation2 + $0x58] sm:$0xff] %v480_v14  ;;  %528 = vst [vmem:[#allocation2 + $0xd8] sm:$0xff] %v496_v15  ;;  %v310_v17 = vpop.f32.mrb[12].mxu0  ;;  %v358_v18 = vpop.f32.mrb[12].mxu1 }
 0x130   :  { %v481_v19 = vadd.f32 %v1185_v24, %v310_v17  ;;  %v497_v20 = vadd.f32 %v462_v16, %v358_v18  ;;  %v312_v21 = vpop.f32.mrb[13].mxu0  ;;  %v360_v22 = vpop.f32.mrb[13].mxu1 }
 0x131   :  { %v482_v26 = vadd.f32 %v1185_v24, %v312_v21  ;;  %v498_v27 = vadd.f32 %v462_v16, %v360_v22 }
 0x132   :  { %513 = vst [vmem:[#allocation2 + $0x60] sm:$0xff] %v481_v19  ;;  %529 = vst [vmem:[#allocation2 + $0xe0] sm:$0xff] %v497_v20 }
 0x133   :  { %514 = vst [vmem:[#allocation2 + $0x68] sm:$0xff] %v482_v26  ;;  %530 = vst [vmem:[#allocation2 + $0xe8] sm:$0xff] %v498_v27  ;;  %v316_v23 = vpop.f32.mrb[14].mxu0  ;;  %v364_v29 = vpop.f32.mrb[14].mxu1 }
 0x134   :  { %v483_v30 = vadd.f32 %v1187_v25, %v316_v23  ;;  %v499_v31 = vadd.f32 %v467_v28, %v364_v29  ;;  %v318_v32 = vpop.f32.mrb[15].mxu0  ;;  %v366_v33 = vpop.f32.mrb[15].mxu1 }
 0x135   :  { %v484_v34 = vadd.f32 %v1187_v25, %v318_v32  ;;  %v500_v35 = vadd.f32 %v467_v28, %v366_v33 }
 0x136   :  { %515 = vst [vmem:[#allocation2 + $0x70] sm:$0xff] %v483_v30  ;;  %531 = vst [vmem:[#allocation2 + $0xf0] sm:$0xff] %v499_v31 }
 0x137   :  { %516 = vst [vmem:[#allocation2 + $0x78] sm:$0xff] %v484_v34  ;;  %532 = vst [vmem:[#allocation2 + $0xf8] sm:$0xff] %v500_v35 }
 0x138   :  { %842 = shalt.err (!%p839_p4)
}
 0x139   :  { %s843_s6 = scalar_lea.hbm %s1212_s3, 4096 }
 0x13a   :  { %p844_p5 = scmp.ne.s32.totalorder %s1212_s3, %s843_s6  ;;  %p847_p6 = scmp.lt.u32.totalorder %s843_s6, %s1212_s3 }
 0x13c   :  { %p849_p7 = pnand %p847_p6, %p844_p5 }
 0x13e   :  { %852 = shalt.err (!%p849_p7)
}
 0x13f   :  { %s857_s10 = smov 256   ;;  %s858_s11 = smov 16  }
 0x140   :  { %644 = dma.vmem_to_hbm [thread:$0]  %s639_s29, 4096, %s1212_s3, [#allocation3], %s857_s10, %s857_s10, %s858_s11  }
 0x141   :  { %853 = dma.done.wait [#allocation3], 4096  }
 0x142   :  { %854 = vsyncadd [#allocation3], 4294963200 }
 0x143   :  { %648 = vsyncpa [#allocation3], 1 }

</bundles_post_ra>
